<compile_context>
chip_gen: v5e
topology: v5e:2x2
jax: 0.10.0
libtpu: 0.0.40
codegen_flags: <defaults>
</compile_context>

<pallas_src>
import functools

import jax
import jax.numpy as jnp
from jax.experimental import pallas as pl
from jax.experimental.pallas import tpu as pltpu


def _attention_kernel(x_ref, tmat_ref, w1rep_ref, b1_ref, w2_ref, b2_ref,
                      o_ref, acc_ref, *, hw, hw_tile, needs_mask):
    s = pl.program_id(1)
    n_s = pl.num_programs(1)

    @pl.when(s == 0)
    def _init():
        acc_ref[...] = jnp.zeros_like(acc_ref)

    def _accumulate(mask_tail):
        x = x_ref[...].astype(jnp.float32)            # (rows_tile, hw_tile)
        if mask_tail:
            # Lane iota vs. scalar remaining-count: only built for the tail tile.
            lane = jax.lax.broadcasted_iota(jnp.int32, (1, hw_tile), 1)
            rem = hw - s * hw_tile
            x = jnp.where(lane < rem, x, 0.0)
        acc_ref[...] += jnp.sum(x, axis=-1, keepdims=True)

    if needs_mask:
        # Full tiles: plain sum (no per-element iota/cmp/select work).
        @pl.when(s < n_s - 1)
        def _full_tile():
            _accumulate(False)

        # Ragged tail: masked sum, last step only.
        @pl.when(s == n_s - 1)
        def _ragged_tail():
            _accumulate(True)
    else:
        _accumulate(False)

    @pl.when(s == n_s - 1)
    def _finalize():
        # acc holds per-row (b*C + c) spatial sums; 1/HW is folded into W1rep.
        # Un-flatten rows -> (batch, channel) is fused into the first matmul:
        #   h[b, j] = sum_r T[b, r] * acc[r] * W1[r % C, j]
        pooled = acc_ref[...]                                   # (rows_tile, 1)
        h = jnp.dot(tmat_ref[...], pooled * w1rep_ref[...],
                    preferred_element_type=jnp.float32) + b1_ref[...]
        h = jnp.maximum(h, 0.0)
        sc = jnp.dot(h, w2_ref[...],
                     preferred_element_type=jnp.float32) + b2_ref[...]
        sc = sc - jnp.max(sc, axis=-1, keepdims=True)
        e = jnp.exp(sc)
        # Exact divide: epilogue runs once per batch tile, accuracy is free.
        o_ref[...] = e / jnp.sum(e, axis=-1, keepdims=True)


def _round_up(v, m):
    return -(-v // m) * m


def _choose_b_tile(batch, c_dim, sub):
    """Largest divisor of `batch` giving >=2 batch programs with legal blocks."""
    def valid(d):
        rows_ok = ((d * c_dim) % sub == 0) or (d == batch)   # x block sublane dim
        out_ok = (d % 8 == 0) or (d == batch)                 # output block sublane dim
        return rows_ok and out_ok

    multi = [d for d in range(1, batch + 1)
             if batch % d == 0 and valid(d) and batch // d >= 2]
    return max(multi) if multi else batch


def _target_tile_bytes():
    """Per-generation x-tile budget (dense bytes, double-buffered by Pallas)."""
    try:
        kind = jax.devices()[0].device_kind.lower()
    except Exception:
        return 4 << 20
    if "v2" in kind or "v3" in kind or "v4" in kind or "v5" in kind:
        return 3 << 20      # 16 MiB default scoped VMEM; ~820 GB/s hides overhead
    if "v7" in kind or "7x" in kind:
        return 10 << 20     # 3.2 TB/s HBM: bigger tiles amortize per-step overhead
    return 6 << 20          # v6e-class (32 MiB default scoped VMEM)


def attention_layer(x, w1, b1, w2, b2, temperature=1.0):
    """x: (B, C, H, W). w1: (C, hidden), w2: (hidden, nof). Returns (B, nof) f32."""
    B, C, H, W = x.shape
    hidden = w1.shape[1]
    nof = w2.shape[1]
    HW = H * W
    R = B * C

    # Fold static scales into the tiny, resident weights.
    inv_temp = 1.0 / float(temperature)
    w1f = (w1 * (1.0 / HW)).astype(jnp.float32)
    b1f = b1.reshape(1, hidden).astype(jnp.float32)
    w2f = (w2 * inv_temp).astype(jnp.float32)
    b2f = (b2 * inv_temp).reshape(1, nof).astype(jnp.float32)

    # Free, contiguous reshape: batch*channel on sublanes, HW on lanes.
    # TODO(synk): if the surrounding net runs bf16, feed x as bf16 (kernel
    # upcasts per-tile to the f32 accumulator) for ~2x on this HBM-bound op.
    x_flat = x.reshape(R, HW)

    itemsize = x_flat.dtype.itemsize
    sub = 8 if itemsize >= 4 else (16 if itemsize == 2 else 32)

    b_tile = _choose_b_tile(B, C, sub)
    rows_tile = b_tile * C
    padded_rows = _round_up(rows_tile, sub)          # exact VMEM footprint per column

    target_bytes = _target_tile_bytes()
    bytes_per_col = itemsize * padded_rows
    max_hw = max(1, target_bytes // bytes_per_col)
    if max_hw >= HW:
        hw_tile = HW
    else:
        hw_tile = max(128, (max_hw // 128) * 128)
    num_s = pl.cdiv(HW, hw_tile)
    needs_mask = (HW % hw_tile) != 0

    # Tiny constant operands that fuse the rows -> (batch, channel) un-flatten
    # into the first linear (T is the same for every batch tile).
    row_to_batch = jnp.arange(rows_tile) // C
    tmat = (row_to_batch[None, :] == jnp.arange(b_tile)[:, None]).astype(jnp.float32)
    w1rep = jnp.tile(w1f, (b_tile, 1))               # (rows_tile, hidden)

    kernel = functools.partial(
        _attention_kernel, hw=HW, hw_tile=hw_tile, needs_mask=needs_mask)

    grid_spec = pltpu.PrefetchScalarGridSpec(
        num_scalar_prefetch=0,
        grid=(B // b_tile, num_s),
        in_specs=[
            # streamed activation chunks (dense: no sublane padding)
            pl.BlockSpec((rows_tile, hw_tile), lambda b, s: (b, s)),
            # tiny constants: constant index_map -> DMA'd once, stay resident
            pl.BlockSpec((b_tile, rows_tile), lambda b, s: (0, 0)),
            pl.BlockSpec((rows_tile, hidden), lambda b, s: (0, 0)),
            pl.BlockSpec((1, hidden), lambda b, s: (0, 0)),
            pl.BlockSpec((hidden, nof), lambda b, s: (0, 0)),
            pl.BlockSpec((1, nof), lambda b, s: (0, 0)),
        ],
        out_specs=pl.BlockSpec((b_tile, nof), lambda b, s: (b, 0)),
        scratch_shapes=[pltpu.VMEM((rows_tile, 1), jnp.float32)],
    )

    cost = pl.CostEstimate(
        flops=int(R * HW + 2 * B * (C * hidden + hidden * nof)),
        transcendentals=int(B * nof),
        bytes_accessed=int(x_flat.size * itemsize
                           + 4 * (tmat.size + w1rep.size + b1f.size
                                  + w2f.size + b2f.size)
                           + 4 * B * nof),
    )

    return pl.pallas_call(
        kernel,
        out_shape=jax.ShapeDtypeStruct((B, nof), jnp.float32),
        grid_spec=grid_spec,
        compiler_params=pltpu.CompilerParams(
            dimension_semantics=("parallel", "arbitrary")),
        cost_estimate=cost,
    )(x_flat, tmat, w1rep, b1f, w2f, b2f)


def init_params(key, c_dim, hidden_dim, nof_kernels):
    """Deterministic init mimicking PyTorch nn.Linear defaults (uniform bounds)."""
    k1, k2, k3, k4 = jax.random.split(key, 4)
    bound1 = 1.0 / (c_dim ** 0.5)
    bound2 = 1.0 / (hidden_dim ** 0.5)
    # Stored as (in_features, out_features) so the kernel computes x @ W.
    w1 = jax.random.uniform(k1, (c_dim, hidden_dim), jnp.float32, -bound1, bound1)
    b1 = jax.random.uniform(k2, (hidden_dim,), jnp.float32, -bound1, bound1)
    w2 = jax.random.uniform(k3, (hidden_dim, nof_kernels), jnp.float32, -bound2, bound2)
    b2 = jax.random.uniform(k4, (nof_kernels,), jnp.float32, -bound2, bound2)
    return w1, b1, w2, b2


if __name__ == "__main__":
    B, C, H, W = 2, 4, 16, 16
    hidden_dim, nof_kernels = 32, 8
    temperature = 2.0

    key = jax.random.PRNGKey(0)
    kx, kp = jax.random.split(key)
    x = jax.random.normal(kx, (B, C, H, W), dtype=jnp.float32)
    w1, b1, w2, b2 = init_params(kp, C, hidden_dim, nof_kernels)

    out = attention_layer(x, w1, b1, w2, b2, temperature)
    out = jax.block_until_ready(out)

    # Pure-JAX reference of the same math.
    pooled = jnp.mean(x, axis=(2, 3))
    h = jnp.maximum(pooled @ w1 + b1, 0.0)
    ref = jax.nn.softmax((h @ w2 + b2) / temperature, axis=-1)
    assert out.shape == (B, nof_kernels)
    assert jnp.allclose(out, ref, atol=1e-4), "mismatch vs reference"
    assert jnp.allclose(jnp.sum(out, axis=-1), 1.0, atol=1e-4)

    print("KERNEL_OK")
</pallas_src>

<mosaic_0001>
module attributes {stable_mosaic.version = 11 : i64} {
  func.func @_attention_kernel(%arg0: i32, %arg1: i32, %arg2: memref<8x256xf32, #tpu.memory_space<vmem>>, %arg3: memref<2x8xf32, #tpu.memory_space<vmem>>, %arg4: memref<8x32xf32, #tpu.memory_space<vmem>>, %arg5: memref<1x32xf32, #tpu.memory_space<vmem>>, %arg6: memref<32x8xf32, #tpu.memory_space<vmem>>, %arg7: memref<1x8xf32, #tpu.memory_space<vmem>>, %arg8: memref<2x8xf32, #tpu.memory_space<vmem>>, %arg9: memref<8x1xf32, #tpu.memory_space<vmem>>) attributes {dimension_semantics = [#tpu.dimension_semantics<parallel>, #tpu.dimension_semantics<arbitrary>], iteration_bounds = array<i64: 1, 1>, scalar_prefetch = 0 : i64, scratch_operands = 1 : i64, tpu.core_type = #tpu.core_type<tc>, window_params = [{transform_indices = @transform_0, window_bounds = array<i64: 8, 256>}, {pipeline_mode = #tpu.pipeline_mode<synchronous>, transform_indices = @transform_1, window_bounds = array<i64: 2, 8>}, {pipeline_mode = #tpu.pipeline_mode<synchronous>, transform_indices = @transform_2, window_bounds = array<i64: 8, 32>}, {pipeline_mode = #tpu.pipeline_mode<synchronous>, transform_indices = @transform_3, window_bounds = array<i64: 1, 32>}, {pipeline_mode = #tpu.pipeline_mode<synchronous>, transform_indices = @transform_4, window_bounds = array<i64: 32, 8>}, {pipeline_mode = #tpu.pipeline_mode<synchronous>, transform_indices = @transform_5, window_bounds = array<i64: 1, 8>}, {transform_indices = @transform_6, window_bounds = array<i64: 2, 8>}]} {
    %c0_i32 = arith.constant 0 : i32
    %0 = arith.cmpi eq, %arg1, %c0_i32 : i32
    %1 = arith.extui %0 : i1 to i32
    %c0_i32_0 = arith.constant 0 : i32
    %2 = arith.cmpi ne, %1, %c0_i32_0 : i32
    scf.if %2 {
      %cst_8 = arith.constant 0.000000e+00 : f32
      %12 = vector.broadcast %cst_8 : f32 to vector<8x1xf32>
      %c0_9 = arith.constant 0 : index
      %c0_10 = arith.constant 0 : index
      %13 = vector.load %arg9[%c0_9, %c0_10] : memref<8x1xf32, #tpu.memory_space<vmem>>, vector<8x1xf32>
      tpu.vector_store %arg9[%c0_9, %c0_10], %12 {strides = array<i32>} : memref<8x1xf32, #tpu.memory_space<vmem>>, vector<8x1xf32>,
    } else {
    }
    %c0 = arith.constant 0 : index
    %c0_1 = arith.constant 0 : index
    %3 = vector.load %arg2[%c0, %c0_1] : memref<8x256xf32, #tpu.memory_space<vmem>>, vector<8x256xf32>
    %c0_2 = arith.constant 0 : index
    %c0_3 = arith.constant 0 : index
    %4 = vector.load %arg9[%c0_2, %c0_3] : memref<8x1xf32, #tpu.memory_space<vmem>>, vector<8x1xf32>
    %cst = arith.constant dense<0.000000e+00> : vector<8xf32>
    %5 = vector.multi_reduction <add>, %3, %cst [1] : vector<8x256xf32> to vector<8xf32>
    %6 = vector.shape_cast %5 : vector<8xf32> to vector<8x1xf32>
    %7 = arith.addf %4, %6 : vector<8x1xf32>
    %c0_4 = arith.constant 0 : index
    %c0_5 = arith.constant 0 : index
    %8 = vector.load %arg9[%c0_4, %c0_5] : memref<8x1xf32, #tpu.memory_space<vmem>>, vector<8x1xf32>
    tpu.vector_store %arg9[%c0_4, %c0_5], %7 {strides = array<i32>} : memref<8x1xf32, #tpu.memory_space<vmem>>, vector<8x1xf32>,
    %c0_i32_6 = arith.constant 0 : i32
    %9 = arith.cmpi eq, %arg1, %c0_i32_6 : i32
    %10 = arith.extui %9 : i1 to i32
    %c0_i32_7 = arith.constant 0 : i32
    %11 = arith.cmpi ne, %10, %c0_i32_7 : i32
    scf.if %11 {
      %c0_8 = arith.constant 0 : index
      %c0_9 = arith.constant 0 : index
      %12 = vector.load %arg9[%c0_8, %c0_9] : memref<8x1xf32, #tpu.memory_space<vmem>>, vector<8x1xf32>
      %c0_10 = arith.constant 0 : index
      %c0_11 = arith.constant 0 : index
      %13 = vector.load %arg3[%c0_10, %c0_11] : memref<2x8xf32, #tpu.memory_space<vmem>>, vector<2x8xf32>
      %c0_12 = arith.constant 0 : index
      %c0_13 = arith.constant 0 : index
      %14 = vector.load %arg4[%c0_12, %c0_13] : memref<8x32xf32, #tpu.memory_space<vmem>>, vector<8x32xf32>
      %15 = vector.broadcast %12 : vector<8x1xf32> to vector<8x32xf32>
      %16 = arith.mulf %15, %14 : vector<8x32xf32>
      %cst_14 = arith.constant dense<0.000000e+00> : vector<2x32xf32>
      %17 = tpu.matmul %13, %16, %cst_14 {dimension_numbers = #tpu.dot_dimension_numbers<[1], [0], [0], [1], [0, 0, 1, 1], [], []>} : vector<2x8xf32>, vector<8x32xf32>, vector<2x32xf32> -> vector<2x32xf32>
      %c0_15 = arith.constant 0 : index
      %c0_16 = arith.constant 0 : index
      %18 = vector.load %arg5[%c0_15, %c0_16] : memref<1x32xf32, #tpu.memory_space<vmem>>, vector<1x32xf32>
      %19 = vector.broadcast %18 : vector<1x32xf32> to vector<2x32xf32>
      %20 = arith.addf %17, %19 : vector<2x32xf32>
      %cst_17 = arith.constant 0.000000e+00 : f32
      %21 = vector.broadcast %cst_17 : f32 to vector<2x32xf32>
      %22 = arith.maximumf %20, %21 : vector<2x32xf32>
      %c0_18 = arith.constant 0 : index
      %c0_19 = arith.constant 0 : index
      %23 = vector.load %arg6[%c0_18, %c0_19] : memref<32x8xf32, #tpu.memory_space<vmem>>, vector<32x8xf32>
      %cst_20 = arith.constant dense<0.000000e+00> : vector<2x8xf32>
      %24 = tpu.matmul %22, %23, %cst_20 {dimension_numbers = #tpu.dot_dimension_numbers<[1], [0], [0], [1], [0, 0, 1, 1], [], []>} : vector<2x32xf32>, vector<32x8xf32>, vector<2x8xf32> -> vector<2x8xf32>
      %c0_21 = arith.constant 0 : index
      %c0_22 = arith.constant 0 : index
      %25 = vector.load %arg7[%c0_21, %c0_22] : memref<1x8xf32, #tpu.memory_space<vmem>>, vector<1x8xf32>
      %26 = vector.broadcast %25 : vector<1x8xf32> to vector<2x8xf32>
      %27 = arith.addf %24, %26 : vector<2x8xf32>
      %cst_23 = arith.constant dense<0xFF800000> : vector<2xf32>
      %28 = vector.multi_reduction <maximumf>, %27, %cst_23 [1] : vector<2x8xf32> to vector<2xf32>
      %29 = vector.shape_cast %28 : vector<2xf32> to vector<2x1xf32>
      %30 = vector.broadcast %29 : vector<2x1xf32> to vector<2x8xf32>
      %31 = arith.subf %27, %30 : vector<2x8xf32>
      %32 = math.exp %31 : vector<2x8xf32>
      %cst_24 = arith.constant dense<0.000000e+00> : vector<2xf32>
      %33 = vector.multi_reduction <add>, %32, %cst_24 [1] : vector<2x8xf32> to vector<2xf32>
      %34 = vector.shape_cast %33 : vector<2xf32> to vector<2x1xf32>
      %35 = vector.broadcast %34 : vector<2x1xf32> to vector<2x8xf32>
      %36 = arith.divf %32, %35 : vector<2x8xf32>
      %c0_25 = arith.constant 0 : index
      %c0_26 = arith.constant 0 : index
      %37 = vector.load %arg8[%c0_25, %c0_26] : memref<2x8xf32, #tpu.memory_space<vmem>>, vector<2x8xf32>
      tpu.vector_store %arg8[%c0_25, %c0_26], %36 {strides = array<i32>} : memref<2x8xf32, #tpu.memory_space<vmem>>, vector<2x8xf32>,
    } else {
    }
    return
  }
  func.func @transform_0(%arg0: i32, %arg1: i32) -> (i32, i32) {
    %c0_i32 = arith.constant 0 : i32
    return %arg0, %arg1 : i32, i32
  }
  func.func @transform_1(%arg0: i32, %arg1: i32) -> (i32, i32) {
    %c0_i32 = arith.constant 0 : i32
    %c0_i32_0 = arith.constant 0 : i32
    %c0_i32_1 = arith.constant 0 : i32
    return %c0_i32, %c0_i32_0 : i32, i32
  }
  func.func @transform_2(%arg0: i32, %arg1: i32) -> (i32, i32) {
    %c0_i32 = arith.constant 0 : i32
    %c0_i32_0 = arith.constant 0 : i32
    %c0_i32_1 = arith.constant 0 : i32
    return %c0_i32, %c0_i32_0 : i32, i32
  }
  func.func @transform_3(%arg0: i32, %arg1: i32) -> (i32, i32) {
    %c0_i32 = arith.constant 0 : i32
    %c0_i32_0 = arith.constant 0 : i32
    %c0_i32_1 = arith.constant 0 : i32
    return %c0_i32, %c0_i32_0 : i32, i32
  }
  func.func @transform_4(%arg0: i32, %arg1: i32) -> (i32, i32) {
    %c0_i32 = arith.constant 0 : i32
    %c0_i32_0 = arith.constant 0 : i32
    %c0_i32_1 = arith.constant 0 : i32
    return %c0_i32, %c0_i32_0 : i32, i32
  }
  func.func @transform_5(%arg0: i32, %arg1: i32) -> (i32, i32) {
    %c0_i32 = arith.constant 0 : i32
    %c0_i32_0 = arith.constant 0 : i32
    %c0_i32_1 = arith.constant 0 : i32
    return %c0_i32, %c0_i32_0 : i32, i32
  }
  func.func @transform_6(%arg0: i32, %arg1: i32) -> (i32, i32) {
    %c0_i32 = arith.constant 0 : i32
    %c0_i32_0 = arith.constant 0 : i32
    return %arg0, %c0_i32 : i32, i32
  }
}

</mosaic_0001>

<bundles_post_ra>
// kernel: tpu_custom_call.1
= control target key start
LH: loop header
LB: loop body
LE: loop exit
PB: predicated region body
PF: predicated region fallthrough
CT: control target
= control target key end

     0   :  { %s266_s0 = inlined_call_operand.vmem [shape: f32[8,256], index: 0, kind: input, shape index: {}]   ;;  %s267_s1 = inlined_call_operand.vmem [shape: f32[2,8], index: 1, kind: input, shape index: {}]   ;;  %s268_s2 = inlined_call_operand.vmem [shape: f32[8,32], index: 2, kind: input, shape index: {}]   ;;  %s269_s3 = inlined_call_operand.vmem [shape: f32[1,32], index: 3, kind: input, shape index: {}]   ;;  %s270_s4 = inlined_call_operand.vmem [shape: f32[32,8], index: 4, kind: input, shape index: {}]   ;;  %s271_s5 = inlined_call_operand.vmem [shape: f32[1,8], index: 5, kind: input, shape index: {}]   ;;  %s272_s6 = inlined_call_operand.hbm [shape: f32[2,8], index: 6, kind: output, shape index: {}]  }
   0x1   :  { %v30_v0 = vld [vmem:[%s266_s0] sm:$0xff]  ;;  %v31_v1 = vld [vmem:[%s266_s0 + $0x8] sm:$0xff] }
   0x2   :  { %v33_v2 = vadd.f32 %v31_v1, %v30_v0 }
   0x3   :  { %11 = vsyncpa [#allocation4], 0  ;;  %vm28_vm0 = vcmask 7168   ;;  %v192_v3 = vmov 0.0   ;;  %v193_v4 = vmov 0   ;;  %v83_v9 = vld [vmem:[%s270_s4 + $0x18] sm:$0xff] }
   0x4   :  { %34 = vadd.xlane.f32.xlu0 %v33_v2  ;;  %29 = vst.msk [vmem:[#allocation2] sm:$0xff] %vm28_vm0, %v192_v3  ;;  %104 = vmatpush.msra.mxu1 %v83_v9  ;;  %v44_v10 = vld [vmem:[%s268_s2] sm:$0xff]  ;;  %vm55_vm1 = vcmask 64512   ;;  %v82_v14 = vld [vmem:[%s270_s4 + $0x10] sm:$0xff]  ;;  %v81_v15 = vld [vmem:[%s270_s4 + $0x8] sm:$0xff]  ;;  %vm88_vm2 = vcmask 261120  }
   0x5   :  { %159 = vset.pattern.permute.xlu0 %v193_v4  ;;  %v43_v13 = vld [vmem:[%s267_s1] sm:$0x3]  ;;  %vm112_vm3 = vcmask 58368   ;;  %s145_s15 = sshll.u32 %s272_s6, 4  ;;  %s146_s15 = int_to_ptr.hbm [resolvable:$true] %s145_s15 }
   0x6   :  { %105 = vmatpush.msra.mxu1 %v82_v14  ;;  %v80_v16 = vld [vmem:[%s270_s4] sm:$0xff] }
   0x7   :  { %v160_v17 = vld [vmem:[%s269_s3] ss:$0 sm:$0xff]  ;;  %s194_s3 = smov [#allocation3]  }
   0x8   :  { %106 = vmatpush.msra.mxu1 %v81_v15  ;;  %v161_v21 = vld [vmem:[%s271_s5] ss:$0 sm:$0xff]  ;;  %s143_s4 = sshll.u32 %s194_s3, 4  ;;  %s144_s4 = int_to_ptr.vmem [resolvable:$true] %s143_s4 }
   0xa   :  { %107 = vmatpush.msra.mxu1 %v80_v16 }
   0xb   :  { %v32_v5 = vld [vmem:[#allocation2] sm:$0xff] }
  0x77   :  { %v35_v6 = vpop.xlane.xlu0 %34 }
  0x78   :  { %v36_v7 = vadd.f32 %v35_v6, %v32_v5 }
  0x7a   :  { %38 = vst.msk [vmem:[#allocation2] sm:$0xff] %vm28_vm0, %v36_v7 }
  0x81   :  { %v42_v8 = vld [vmem:[#allocation2] sm:$0xff] }
  0x82   :  { %47 = vperm.xlu0 %159, %v42_v8  }
  0xf4   :  { %v48_v11 = vpop.permute.xlu0 %47 }
  0xf5   :  { %v50_v12 = vmul.f32 %v48_v11, %v44_v10 }
  0xf7   :  { %74 = vmatpush.msra.mxu0 %v50_v12 }
  0xf8   :  { %154 = vmatmul.msk.f32.vlgmr.msra.gmra.mxu0 %vm55_vm1, %v43_v13 }
 0x175   :  { %v76_v18 = vpop.f32.mrf.mxu0 }
 0x176   :  { %v77_v19 = vadd.f32 %v160_v17, %v76_v18 }
 0x178   :  { %v79_v20 = vmax.f32 %v77_v19, 0.0 }
 0x17a   :  { %155 = vmatmul.msk.f32.vlgmr.msra.gmra.mxu1 %vm88_vm2, %v79_v20 }
 0x1f7   :  { %v109_v22 = vpop.f32.mrf.mxu1 }
 0x1f8   :  { %v110_v23 = vadd.f32 %v161_v21, %v109_v22 }
 0x1fa   :  { %v113_v24 = vsel %vm112_vm3, %v110_v23, -inf }
 0x1fb   :  { %114 = vmax.xlane.f32.xlu1 %v113_v24 }
 0x26e   :  { %v115_v25 = vpop.xlane.xlu1 %114 }
 0x26f   :  { %v116_v26 = vsub.f32 %v110_v23, %v115_v25 }
 0x271   :  { %v117_v27 = vmul.f32 1.442695, %v116_v26 }
 0x273   :  { %162 = vpow2.f32 %v117_v27 }
 0x279   :  { %v163_v28 = vpop.eup %162 }
 0x27a   :  { %v119_v29 = vsel %vm112_vm3, %v163_v28, 0.0 }
 0x27b   :  { %120 = vadd.xlane.f32.xlu1 %v119_v29 }
 0x2ee   :  { %v121_v30 = vpop.xlane.xlu1 %120 }
 0x2ef   :  { %164 = vrcp.f32 %v121_v30  ;;  %v133_v34 = vand.u32 2147483648, %v121_v30  ;;  %v131_v36 = vand.u32 2147483647, %v121_v30  ;;  %vm127_vm5 = vweird.f32 %v121_v30 }
 0x2f1   :  { %v134_v38 = vor.u32 1.1754944e-38, %v133_v34  ;;  %vm132_vm7 = vcmp.eq.f32.partialorder %v131_v36, 8.507059e+37 }
 0x2f5   :  { %v165_v31 = vpop.eup %164 }
 0x2f6   :  { %v123_v32 = vmul.f32 %v165_v31, %v121_v30  ;;  %vm128_vm4 = vweird.f32 %v165_v31 }
 0x2f7   :  { %vm129_vm6 = vmor %vm127_vm5, %vm128_vm4 }
 0x2f8   :  { %v124_v33 = vsub.f32 1.0, %v123_v32 }
 0x2fa   :  { %v125_v35 = vmul.f32 %v165_v31, %v124_v33 }
 0x2fc   :  { %v126_v37 = vadd.f32 %v165_v31, %v125_v35 }
 0x2fe   :  { %v130_v39 = vsel %vm129_vm6, %v165_v31, %v126_v37 }
 0x2ff   :  { %v135_v40 = vsel %vm132_vm7, %v134_v38, %v130_v39 }
 0x300   :  { %v136_v41 = vmul.f32 %v163_v28, %v135_v40 }
 0x302   :  { %137 = vst.msk [vmem:[#allocation3] sm:$0x3] %vm112_vm3, %v136_v41 }
 0x303   :  { %148 = dma.vmem_to_hbm [thread:$0]  %s144_s4, 32, %s146_s15, [#allocation4]  }
 0x304   :  { %190 = dma.done.wait [#allocation4], 32  }
 0x305   :  { %191 = vsyncadd [#allocation4], 4294967264 }
 0x306   :  { %153 = vsyncpa [#allocation4], 1 }

</bundles_post_ra>
